<compile_context>
chip_gen: v7x
topology: tpu7x:2x2x1
jax: 0.10.0
libtpu: 0.0.40
codegen_flags: <defaults>
</compile_context>

<pallas_src>
import functools
import numpy as np
import jax
import jax.numpy as jnp
from jax.experimental import pallas as pl


def frap_kernel(x_ref, wblk_ref, bblk_ref, w3_ref, b3_ref,
                wc1a_ref, wc1b_ref, bc1_ref, g1_ref, be1_ref,
                wc2_ref, bc2_ref, g2_ref, be2_ref,
                wc3_ref, bc3_ref, mask_ref,
                out_ref, *, batch, phases):
    f32 = jnp.float32
    eps = 1e-5
    B, P = batch, phases
    inv_n = 1.0 / float(B * P * (P - 1))          # number of valid (i != j) rows

    # ---- fused per-phase MLP (rows are (batch, phase)) ----------------------
    # x = [xA | xB | x2], wblk = blockdiag(w1, w1, w2): one MXU pass produces
    # h1A | h1B | h2 on the lane axis; ReLU applies blockwise (elementwise).
    h = jnp.maximum(
        jnp.dot(x_ref[...], wblk_ref[...], preferred_element_type=f32)
        + bblk_ref[...], 0.0)                                      # (B*P, 96)
    # rep = oA + oB = (h1A + h1B) @ w3_top + 2*h2 @ w3_bot + 2*b3, realised as
    # one matmul with the pre-stacked weight [w3_top; w3_top; 2*w3_bot].
    rep = jnp.dot(h, w3_ref[...], preferred_element_type=f32) + b3_ref[...]  # (B*P, 64)

    # ---- conv1 folded through the phase pairing -----------------------------
    # emb[(b,i,j)] = [rep[b,i] | rep[b,j]]  =>
    #   conv1(emb)[(b,i,j)] = rep[b,i] @ wc1_top + rep[b,j] @ wc1_bot + bc1.
    repA = jnp.dot(rep, wc1a_ref[...], preferred_element_type=f32)  # (B*P, 64)
    repB = jnp.dot(rep, wc1b_ref[...], preferred_element_type=f32)  # (B*P, 64)
    C = repA.shape[-1]
    a4 = jnp.broadcast_to(repA.reshape(B, P, 1, C), (B, P, P, C))
    b4 = jnp.broadcast_to(repB.reshape(B, 1, P, C), (B, P, P, C))
    # Full P x P pair grid (the i == j diagonal is masked out of the BN stats
    # below and dropped in the wrapper) -> no gather / selection matmul.
    y1 = (a4 + b4).reshape(B * P * P, C) + bc1_ref[...]             # (B*P*P, 64)

    # ---- BatchNorm1 (train mode, batch stats) — one pass on the MXU ---------
    m1 = jnp.dot(mask_ref[...], y1, preferred_element_type=f32) * inv_n
    q1 = jnp.dot(mask_ref[...], y1 * y1, preferred_element_type=f32) * inv_n
    v1 = jnp.maximum(q1 - m1 * m1, 0.0)
    y1 = (y1 - m1) * jax.lax.rsqrt(v1 + eps) * g1_ref[...] + be1_ref[...]

    # ---- conv2 (1x1, 64 -> 16) + BatchNorm2 ---------------------------------
    y2 = jnp.dot(y1, wc2_ref[...], preferred_element_type=f32) + bc2_ref[...]
    m2 = jnp.dot(mask_ref[...], y2, preferred_element_type=f32) * inv_n
    q2 = jnp.dot(mask_ref[...], y2 * y2, preferred_element_type=f32) * inv_n
    v2 = jnp.maximum(q2 - m2 * m2, 0.0)
    y2 = (y2 - m2) * jax.lax.rsqrt(v2 + eps) * g2_ref[...] + be2_ref[...]

    # ---- conv3 (1x1, 16 -> 1) ------------------------------------------------
    out_ref[...] = jnp.dot(y2, wc3_ref[...], preferred_element_type=f32) + bc3_ref[...]


def init_params(key, obs_size, phase_size):
    """Deterministic synthetic parameters (weights stored pre-transposed: (in, out))."""
    ks = jax.random.split(key, 12)

    def w(k, shape, fan_in):
        return (jax.random.normal(k, shape, jnp.float32) / np.sqrt(fan_in)).astype(jnp.float32)

    p = {}
    p["w1"] = w(ks[0], (obs_size, 32), obs_size)          # linear_h1.weight.T
    p["b1"] = w(ks[1], (1, 32), obs_size)
    p["w2"] = w(ks[2], (phase_size, 32), phase_size)       # linear_h2.weight.T
    p["b2"] = w(ks[3], (1, 32), phase_size)
    p["w3"] = w(ks[4], (64, 64), 64)                       # linear.weight.T
    p["b3"] = w(ks[5], (1, 64), 64)
    p["wc1"] = w(ks[6], (128, 64), 128)                    # conv1.weight[:, :, 0, 0].T
    p["bc1"] = w(ks[7], (1, 64), 128)
    p["g1"] = jnp.ones((1, 64), jnp.float32)               # bn1.weight
    p["be1"] = jnp.zeros((1, 64), jnp.float32)             # bn1.bias
    p["wc2"] = w(ks[8], (64, 16), 64)                      # conv2.weight[:, :, 0, 0].T
    p["bc2"] = w(ks[9], (1, 16), 64)
    p["g2"] = jnp.ones((1, 16), jnp.float32)               # bn2.weight
    p["be2"] = jnp.zeros((1, 16), jnp.float32)             # bn2.bias
    p["wc3"] = w(ks[10], (16, 1), 16)                      # conv3.weight[:, :, 0, 0].T
    p["bc3"] = w(ks[11], (1, 1), 16)
    return p


def frap_forward(obs_h1_A, obs_h1_B, obs_h2, params, action_size):
    B, P, obs_size = obs_h1_A.shape
    assert P == action_size
    phase_size = obs_h2.shape[-1]
    p = params
    f32 = jnp.float32

    # --- glue: flatten (batch, phase) rows and build fused weights (O(B) only) ---
    xA = obs_h1_A.reshape(B * P, obs_size).astype(f32)
    xB = obs_h1_B.reshape(B * P, obs_size).astype(f32)
    x2 = obs_h2.reshape(B * P, phase_size).astype(f32)
    x_cat = jnp.concatenate([xA, xB, x2], axis=1)                 # (B*P, 2*obs+phase)

    zo = jnp.zeros((obs_size, 32), f32)
    zp = jnp.zeros((phase_size, 32), f32)
    w_blk = jnp.concatenate([
        jnp.concatenate([p["w1"], zo, zo], axis=1),
        jnp.concatenate([zo, p["w1"], zo], axis=1),
        jnp.concatenate([zp, zp, p["w2"]], axis=1)], axis=0)      # (2*obs+phase, 96)
    b_blk = jnp.concatenate([p["b1"], p["b1"], p["b2"]], axis=1)  # (1, 96)

    w3_stack = jnp.concatenate(
        [p["w3"][:32], p["w3"][:32], 2.0 * p["w3"][32:]], axis=0)  # (96, 64)
    b3_eff = 2.0 * p["b3"]

    wc1_top = p["wc1"][:64]        # multiplies rep of phase i
    wc1_bot = p["wc1"][64:]        # multiplies rep of competing phase j

    # Off-diagonal mask over the (b, i, j) row grid of size B*P*P (batch-independent
    # structure, O(B) bytes).  Used as the "ones row" of the BN statistics dots.
    mask_np = np.ones((B, P, P), np.float32)
    mask_np[:, np.arange(P), np.arange(P)] = 0.0
    mask = jnp.asarray(mask_np.reshape(1, B * P * P))

    kernel = functools.partial(frap_kernel, batch=B, phases=P)
    out_flat = pl.pallas_call(
        kernel,
        out_shape=jax.ShapeDtypeStruct((B * P * P, 1), f32),
    )(x_cat, w_blk, b_blk, w3_stack, b3_eff,
      wc1_top, wc1_bot, p["bc1"], p["g1"], p["be1"],
      p["wc2"], p["bc2"], p["g2"], p["be2"],
      p["wc3"], p["bc3"], mask)

    # --- glue: drop the i == j diagonal and emit NCHW (B, 1, P, P-1) ---
    out_sq = out_flat.reshape(B, P, P)
    rows = np.repeat(np.arange(P), P - 1)
    cols = np.array([j for i in range(P) for j in range(P) if j != i])
    out_od = out_sq[:, rows, cols].reshape(B, P, P - 1)
    return out_od[:, None, :, :]


def frap_reference(obs_h1_A, obs_h1_B, obs_h2, params, action_size):
    """Pure-JAX reference mirroring the PyTorch forward (train-mode BN)."""
    p = params
    B, P, _ = obs_h1_A.shape
    eps = 1e-5

    def mlp(xa, xb, x2):
        h1a = jax.nn.relu(xa @ p["w1"] + p["b1"])
        h1b = jax.nn.relu(xb @ p["w1"] + p["b1"])
        h2 = jax.nn.relu(x2 @ p["w2"] + p["b2"])
        oa = jnp.concatenate([h1a, h2], -1) @ p["w3"] + p["b3"]
        ob = jnp.concatenate([h1b, h2], -1) @ p["w3"] + p["b3"]
        return oa + ob

    rep = jax.vmap(mlp, in_axes=(1, 1, 1), out_axes=1)(obs_h1_A, obs_h1_B, obs_h2)  # (B,P,64)

    rows = []
    for i in range(P):
        for j in range(P):
            if i == j:
                continue
            rows.append(jnp.concatenate([rep[:, i], rep[:, j]], axis=-1))  # (B, 128)
    emb = jnp.stack(rows, axis=1)                  # (B, P*(P-1), 128)
    emb = emb.reshape(B * P * (P - 1), 128)

    def bn(y, g, b):
        m = jnp.mean(y, axis=0, keepdims=True)
        v = jnp.mean((y - m) ** 2, axis=0, keepdims=True)
        return (y - m) / jnp.sqrt(v + eps) * g + b

    y = bn(emb @ p["wc1"] + p["bc1"], p["g1"], p["be1"])
    y = bn(y @ p["wc2"] + p["bc2"], p["g2"], p["be2"])
    y = y @ p["wc3"] + p["bc3"]
    return y.reshape(B, P, P - 1, 1).transpose(0, 3, 1, 2)


if __name__ == "__main__":
    B = 2
    obs_size = 16
    phase_size = 8
    action_size = 8  # P

    key = jax.random.PRNGKey(0)
    k_par, kA, kB, k2 = jax.random.split(key, 4)

    params = init_params(k_par, obs_size, phase_size)
    obs_h1_A = jax.random.normal(kA, (B, action_size, obs_size), jnp.float32)
    obs_h1_B = jax.random.normal(kB, (B, action_size, obs_size), jnp.float32)
    obs_h2 = jax.random.normal(k2, (B, action_size, phase_size), jnp.float32)

    out = frap_forward(obs_h1_A, obs_h1_B, obs_h2, params, action_size)
    out = jax.block_until_ready(out)

    ref = jax.block_until_ready(
        frap_reference(obs_h1_A, obs_h1_B, obs_h2, params, action_size))

    assert out.shape == (B, 1, action_size, action_size - 1), out.shape
    assert np.allclose(np.asarray(out), np.asarray(ref), atol=1e-4, rtol=1e-4)
    print("KERNEL_OK")
</pallas_src>

<mosaic_0001>
module attributes {stable_mosaic.version = 11 : i64} {
  func.func @frap_kernel(%arg0: memref<16x40xf32, #tpu.memory_space<vmem>>, %arg1: memref<40x96xf32, #tpu.memory_space<vmem>>, %arg2: memref<1x96xf32, #tpu.memory_space<vmem>>, %arg3: memref<96x64xf32, #tpu.memory_space<vmem>>, %arg4: memref<1x64xf32, #tpu.memory_space<vmem>>, %arg5: memref<64x64xf32, #tpu.memory_space<vmem>>, %arg6: memref<64x64xf32, #tpu.memory_space<vmem>>, %arg7: memref<1x64xf32, #tpu.memory_space<vmem>>, %arg8: memref<1x64xf32, #tpu.memory_space<vmem>>, %arg9: memref<1x64xf32, #tpu.memory_space<vmem>>, %arg10: memref<64x16xf32, #tpu.memory_space<vmem>>, %arg11: memref<1x16xf32, #tpu.memory_space<vmem>>, %arg12: memref<1x16xf32, #tpu.memory_space<vmem>>, %arg13: memref<1x16xf32, #tpu.memory_space<vmem>>, %arg14: memref<16x1xf32, #tpu.memory_space<vmem>>, %arg15: memref<1x1xf32, #tpu.memory_space<vmem>>, %arg16: memref<1x128xf32, #tpu.memory_space<vmem>>, %arg17: memref<128x1xf32, #tpu.memory_space<vmem>>) attributes {dimension_semantics = [], scalar_prefetch = 0 : i64, scratch_operands = 0 : i64, tpu.core_type = #tpu.core_type<tc>} {
    %c0 = arith.constant 0 : index
    %c0_0 = arith.constant 0 : index
    %0 = vector.load %arg0[%c0, %c0_0] : memref<16x40xf32, #tpu.memory_space<vmem>>, vector<16x40xf32>
    %c0_1 = arith.constant 0 : index
    %c0_2 = arith.constant 0 : index
    %1 = vector.load %arg1[%c0_1, %c0_2] : memref<40x96xf32, #tpu.memory_space<vmem>>, vector<40x96xf32>
    %cst = arith.constant dense<0.000000e+00> : vector<16x96xf32>
    %2 = tpu.matmul %0, %1, %cst {dimension_numbers = #tpu.dot_dimension_numbers<[1], [0], [0], [1], [0, 0, 1, 1], [], []>} : vector<16x40xf32>, vector<40x96xf32>, vector<16x96xf32> -> vector<16x96xf32>
    %c0_3 = arith.constant 0 : index
    %c0_4 = arith.constant 0 : index
    %3 = vector.load %arg2[%c0_3, %c0_4] : memref<1x96xf32, #tpu.memory_space<vmem>>, vector<1x96xf32>
    %4 = vector.broadcast %3 : vector<1x96xf32> to vector<16x96xf32>
    %5 = arith.addf %2, %4 : vector<16x96xf32>
    %cst_5 = arith.constant 0.000000e+00 : f32
    %6 = vector.broadcast %cst_5 : f32 to vector<16x96xf32>
    %7 = arith.maximumf %5, %6 : vector<16x96xf32>
    %c0_6 = arith.constant 0 : index
    %c0_7 = arith.constant 0 : index
    %8 = vector.load %arg3[%c0_6, %c0_7] : memref<96x64xf32, #tpu.memory_space<vmem>>, vector<96x64xf32>
    %cst_8 = arith.constant dense<0.000000e+00> : vector<16x64xf32>
    %9 = tpu.matmul %7, %8, %cst_8 {dimension_numbers = #tpu.dot_dimension_numbers<[1], [0], [0], [1], [0, 0, 1, 1], [], []>} : vector<16x96xf32>, vector<96x64xf32>, vector<16x64xf32> -> vector<16x64xf32>
    %c0_9 = arith.constant 0 : index
    %c0_10 = arith.constant 0 : index
    %10 = vector.load %arg4[%c0_9, %c0_10] : memref<1x64xf32, #tpu.memory_space<vmem>>, vector<1x64xf32>
    %11 = vector.broadcast %10 : vector<1x64xf32> to vector<16x64xf32>
    %12 = arith.addf %9, %11 : vector<16x64xf32>
    %c0_11 = arith.constant 0 : index
    %c0_12 = arith.constant 0 : index
    %13 = vector.load %arg5[%c0_11, %c0_12] : memref<64x64xf32, #tpu.memory_space<vmem>>, vector<64x64xf32>
    %cst_13 = arith.constant dense<0.000000e+00> : vector<16x64xf32>
    %14 = tpu.matmul %12, %13, %cst_13 {dimension_numbers = #tpu.dot_dimension_numbers<[1], [0], [0], [1], [0, 0, 1, 1], [], []>} : vector<16x64xf32>, vector<64x64xf32>, vector<16x64xf32> -> vector<16x64xf32>
    %c0_14 = arith.constant 0 : index
    %c0_15 = arith.constant 0 : index
    %15 = vector.load %arg6[%c0_14, %c0_15] : memref<64x64xf32, #tpu.memory_space<vmem>>, vector<64x64xf32>
    %cst_16 = arith.constant dense<0.000000e+00> : vector<16x64xf32>
    %16 = tpu.matmul %12, %15, %cst_16 {dimension_numbers = #tpu.dot_dimension_numbers<[1], [0], [0], [1], [0, 0, 1, 1], [], []>} : vector<16x64xf32>, vector<64x64xf32>, vector<16x64xf32> -> vector<16x64xf32>
    %17 = vector.shape_cast %14 : vector<16x64xf32> to vector<2x8x1x64xf32>
    %18 = vector.shape_cast %17 : vector<2x8x1x64xf32> to vector<2x8x1x64xf32>
    %19 = vector.broadcast %18 : vector<2x8x1x64xf32> to vector<2x8x8x64xf32>
    %20 = vector.shape_cast %16 : vector<16x64xf32> to vector<2x1x8x64xf32>
    %21 = vector.shape_cast %20 : vector<2x1x8x64xf32> to vector<2x1x8x64xf32>
    %22 = vector.broadcast %21 : vector<2x1x8x64xf32> to vector<2x8x8x64xf32>
    %23 = arith.addf %19, %22 : vector<2x8x8x64xf32>
    %24 = vector.shape_cast %23 : vector<2x8x8x64xf32> to vector<128x64xf32>
    %c0_17 = arith.constant 0 : index
    %c0_18 = arith.constant 0 : index
    %25 = vector.load %arg7[%c0_17, %c0_18] : memref<1x64xf32, #tpu.memory_space<vmem>>, vector<1x64xf32>
    %26 = vector.broadcast %25 : vector<1x64xf32> to vector<128x64xf32>
    %27 = arith.addf %24, %26 : vector<128x64xf32>
    %c0_19 = arith.constant 0 : index
    %c0_20 = arith.constant 0 : index
    %28 = vector.load %arg16[%c0_19, %c0_20] : memref<1x128xf32, #tpu.memory_space<vmem>>, vector<1x128xf32>
    %cst_21 = arith.constant dense<0.000000e+00> : vector<1x64xf32>
    %29 = tpu.matmul %28, %27, %cst_21 {dimension_numbers = #tpu.dot_dimension_numbers<[1], [0], [0], [1], [0, 0, 1, 1], [], []>} : vector<1x128xf32>, vector<128x64xf32>, vector<1x64xf32> -> vector<1x64xf32>
    %cst_22 = arith.constant 0.00892857183 : f32
    %30 = vector.broadcast %cst_22 : f32 to vector<1x64xf32>
    %31 = arith.mulf %29, %30 : vector<1x64xf32>
    %c0_23 = arith.constant 0 : index
    %c0_24 = arith.constant 0 : index
    %32 = vector.load %arg16[%c0_23, %c0_24] : memref<1x128xf32, #tpu.memory_space<vmem>>, vector<1x128xf32>
    %33 = arith.mulf %27, %27 : vector<128x64xf32>
    %cst_25 = arith.constant dense<0.000000e+00> : vector<1x64xf32>
    %34 = tpu.matmul %32, %33, %cst_25 {dimension_numbers = #tpu.dot_dimension_numbers<[1], [0], [0], [1], [0, 0, 1, 1], [], []>} : vector<1x128xf32>, vector<128x64xf32>, vector<1x64xf32> -> vector<1x64xf32>
    %cst_26 = arith.constant 0.00892857183 : f32
    %35 = vector.broadcast %cst_26 : f32 to vector<1x64xf32>
    %36 = arith.mulf %34, %35 : vector<1x64xf32>
    %37 = arith.mulf %31, %31 : vector<1x64xf32>
    %38 = arith.subf %36, %37 : vector<1x64xf32>
    %cst_27 = arith.constant 0.000000e+00 : f32
    %39 = vector.broadcast %cst_27 : f32 to vector<1x64xf32>
    %40 = arith.maximumf %38, %39 : vector<1x64xf32>
    %41 = vector.broadcast %31 : vector<1x64xf32> to vector<128x64xf32>
    %42 = arith.subf %27, %41 : vector<128x64xf32>
    %cst_28 = arith.constant 9.99999974E-6 : f32
    %43 = vector.broadcast %cst_28 : f32 to vector<1x64xf32>
    %44 = arith.addf %40, %43 : vector<1x64xf32>
    %45 = math.rsqrt %44 : vector<1x64xf32>
    %46 = vector.broadcast %45 : vector<1x64xf32> to vector<128x64xf32>
    %47 = arith.mulf %42, %46 : vector<128x64xf32>
    %c0_29 = arith.constant 0 : index
    %c0_30 = arith.constant 0 : index
    %48 = vector.load %arg8[%c0_29, %c0_30] : memref<1x64xf32, #tpu.memory_space<vmem>>, vector<1x64xf32>
    %49 = vector.broadcast %48 : vector<1x64xf32> to vector<128x64xf32>
    %50 = arith.mulf %47, %49 : vector<128x64xf32>
    %c0_31 = arith.constant 0 : index
    %c0_32 = arith.constant 0 : index
    %51 = vector.load %arg9[%c0_31, %c0_32] : memref<1x64xf32, #tpu.memory_space<vmem>>, vector<1x64xf32>
    %52 = vector.broadcast %51 : vector<1x64xf32> to vector<128x64xf32>
    %53 = arith.addf %50, %52 : vector<128x64xf32>
    %c0_33 = arith.constant 0 : index
    %c0_34 = arith.constant 0 : index
    %54 = vector.load %arg10[%c0_33, %c0_34] : memref<64x16xf32, #tpu.memory_space<vmem>>, vector<64x16xf32>
    %cst_35 = arith.constant dense<0.000000e+00> : vector<128x16xf32>
    %55 = tpu.matmul %53, %54, %cst_35 {dimension_numbers = #tpu.dot_dimension_numbers<[1], [0], [0], [1], [0, 0, 1, 1], [], []>} : vector<128x64xf32>, vector<64x16xf32>, vector<128x16xf32> -> vector<128x16xf32>
    %c0_36 = arith.constant 0 : index
    %c0_37 = arith.constant 0 : index
    %56 = vector.load %arg11[%c0_36, %c0_37] : memref<1x16xf32, #tpu.memory_space<vmem>>, vector<1x16xf32>
    %57 = vector.broadcast %56 : vector<1x16xf32> to vector<128x16xf32>
    %58 = arith.addf %55, %57 : vector<128x16xf32>
    %c0_38 = arith.constant 0 : index
    %c0_39 = arith.constant 0 : index
    %59 = vector.load %arg16[%c0_38, %c0_39] : memref<1x128xf32, #tpu.memory_space<vmem>>, vector<1x128xf32>
    %cst_40 = arith.constant dense<0.000000e+00> : vector<1x16xf32>
    %60 = tpu.matmul %59, %58, %cst_40 {dimension_numbers = #tpu.dot_dimension_numbers<[1], [0], [0], [1], [0, 0, 1, 1], [], []>} : vector<1x128xf32>, vector<128x16xf32>, vector<1x16xf32> -> vector<1x16xf32>
    %cst_41 = arith.constant 0.00892857183 : f32
    %61 = vector.broadcast %cst_41 : f32 to vector<1x16xf32>
    %62 = arith.mulf %60, %61 : vector<1x16xf32>
    %c0_42 = arith.constant 0 : index
    %c0_43 = arith.constant 0 : index
    %63 = vector.load %arg16[%c0_42, %c0_43] : memref<1x128xf32, #tpu.memory_space<vmem>>, vector<1x128xf32>
    %64 = arith.mulf %58, %58 : vector<128x16xf32>
    %cst_44 = arith.constant dense<0.000000e+00> : vector<1x16xf32>
    %65 = tpu.matmul %63, %64, %cst_44 {dimension_numbers = #tpu.dot_dimension_numbers<[1], [0], [0], [1], [0, 0, 1, 1], [], []>} : vector<1x128xf32>, vector<128x16xf32>, vector<1x16xf32> -> vector<1x16xf32>
    %cst_45 = arith.constant 0.00892857183 : f32
    %66 = vector.broadcast %cst_45 : f32 to vector<1x16xf32>
    %67 = arith.mulf %65, %66 : vector<1x16xf32>
    %68 = arith.mulf %62, %62 : vector<1x16xf32>
    %69 = arith.subf %67, %68 : vector<1x16xf32>
    %cst_46 = arith.constant 0.000000e+00 : f32
    %70 = vector.broadcast %cst_46 : f32 to vector<1x16xf32>
    %71 = arith.maximumf %69, %70 : vector<1x16xf32>
    %72 = vector.broadcast %62 : vector<1x16xf32> to vector<128x16xf32>
    %73 = arith.subf %58, %72 : vector<128x16xf32>
    %cst_47 = arith.constant 9.99999974E-6 : f32
    %74 = vector.broadcast %cst_47 : f32 to vector<1x16xf32>
    %75 = arith.addf %71, %74 : vector<1x16xf32>
    %76 = math.rsqrt %75 : vector<1x16xf32>
    %77 = vector.broadcast %76 : vector<1x16xf32> to vector<128x16xf32>
    %78 = arith.mulf %73, %77 : vector<128x16xf32>
    %c0_48 = arith.constant 0 : index
    %c0_49 = arith.constant 0 : index
    %79 = vector.load %arg12[%c0_48, %c0_49] : memref<1x16xf32, #tpu.memory_space<vmem>>, vector<1x16xf32>
    %80 = vector.broadcast %79 : vector<1x16xf32> to vector<128x16xf32>
    %81 = arith.mulf %78, %80 : vector<128x16xf32>
    %c0_50 = arith.constant 0 : index
    %c0_51 = arith.constant 0 : index
    %82 = vector.load %arg13[%c0_50, %c0_51] : memref<1x16xf32, #tpu.memory_space<vmem>>, vector<1x16xf32>
    %83 = vector.broadcast %82 : vector<1x16xf32> to vector<128x16xf32>
    %84 = arith.addf %81, %83 : vector<128x16xf32>
    %c0_52 = arith.constant 0 : index
    %c0_53 = arith.constant 0 : index
    %85 = vector.load %arg14[%c0_52, %c0_53] : memref<16x1xf32, #tpu.memory_space<vmem>>, vector<16x1xf32>
    %cst_54 = arith.constant dense<0.000000e+00> : vector<128x1xf32>
    %86 = tpu.matmul %84, %85, %cst_54 {dimension_numbers = #tpu.dot_dimension_numbers<[1], [0], [0], [1], [0, 0, 1, 1], [], []>} : vector<128x16xf32>, vector<16x1xf32>, vector<128x1xf32> -> vector<128x1xf32>
    %c0_55 = arith.constant 0 : index
    %c0_56 = arith.constant 0 : index
    %87 = vector.load %arg15[%c0_55, %c0_56] : memref<1x1xf32, #tpu.memory_space<vmem>>, vector<1x1xf32>
    %88 = vector.broadcast %87 : vector<1x1xf32> to vector<128x1xf32>
    %89 = arith.addf %86, %88 : vector<128x1xf32>
    %c0_57 = arith.constant 0 : index
    %c0_58 = arith.constant 0 : index
    %90 = vector.load %arg17[%c0_57, %c0_58] : memref<128x1xf32, #tpu.memory_space<vmem>>, vector<128x1xf32>
    tpu.vector_store %arg17[%c0_57, %c0_58], %89 {strides = array<i32>} : memref<128x1xf32, #tpu.memory_space<vmem>>, vector<128x1xf32>,
    return
  }
}

</mosaic_0001>

<bundles_post_ra>
// kernel: tpu_custom_call.1
= control target key start
LH: loop header
LB: loop body
LE: loop exit
PB: predicated region body
PF: predicated region fallthrough
CT: control target
= control target key end

     0   :  { %vm72_vm0 = vcmask 326656   ;;  %vm175_vm1 = vcmask 785408   ;;  %vm265_vm2 = vcmask 523264   ;;  %v2254_v63 = vmov 0.0|0.0   ;;  %s2983_s1 = inlined_call_operand.vmem [shape: f32[40,96], index: 1, kind: input, shape index: {}]   ;;  %s2984_s0 = inlined_call_operand.vmem [shape: f32[16,40], index: 0, kind: input, shape index: {}]   ;;  %s2985_s3 = inlined_call_operand.vmem [shape: f32[96,64], index: 3, kind: input, shape index: {}]   ;;  %s2986_s5 = inlined_call_operand.vmem [shape: f32[64,64], index: 5, kind: input, shape index: {}]   ;;  %s2987_s2 = inlined_call_operand.vmem [shape: f32[1,96], index: 2, kind: input, shape index: {}]   ;;  %s2988_s6 = inlined_call_operand.vmem [shape: f32[64,64], index: 6, kind: input, shape index: {}]   ;;  %s2989_s4 = inlined_call_operand.vmem [shape: f32[1,64], index: 4, kind: input, shape index: {}]   ;;  %s2990_s7 = inlined_call_operand.vmem [shape: f32[1,64], index: 7, kind: input, shape index: {}]   ;;  %s2991_s16 = inlined_call_operand.vmem [shape: f32[1,128], index: 16, kind: input, shape index: {}]   ;;  %s2992_s10 = inlined_call_operand.vmem [shape: f32[64,16], index: 10, kind: input, shape index: {}]   ;;  %s2993_s8 = inlined_call_operand.vmem [shape: f32[1,64], index: 8, kind: input, shape index: {}]   ;;  %s2994_s9 = inlined_call_operand.vmem [shape: f32[1,64], index: 9, kind: input, shape index: {}]   ;;  %s2995_s11 = inlined_call_operand.vmem [shape: f32[1,16], index: 11, kind: input, shape index: {}]   ;;  %s2996_s14 = inlined_call_operand.vmem [shape: f32[16,1], index: 14, kind: input, shape index: {}]   ;;  %s2997_s15 = inlined_call_operand.<no memory space> [shape: f32[1,1], index: 15, kind: input, shape index: {}]   ;;  %s2998_s12 = inlined_call_operand.vmem [shape: f32[1,16], index: 12, kind: input, shape index: {}]   ;;  %s2999_s13 = inlined_call_operand.vmem [shape: f32[1,16], index: 13, kind: input, shape index: {}]   ;;  %s3000_s17 = inlined_call_operand.vmem [shape: f32[128,1], index: 17, kind: output, shape index: {}]  }
   0x1   :  { %3003 = sst [smem:[#allocation3_spill]] %s2983_s1  ;;  %v156_v7 = vld [vmem:[%s2985_s3] sm:$0xff]  ;;  %v157_v8 = vld [vmem:[%s2985_s3 + $0x8] sm:$0xff]  ;;  %v158_v10 = vld [vmem:[%s2985_s3 + $0x10] sm:$0xff]  ;;  %vm2255_vm3 = vmmov 0   ;;  %vm1365_vm4 = vcmask 130048  }
   0x2   :  { %3004 = sst [smem:[#allocation4_spill]] %s2984_s0  ;;  %s3005_s26 = sld [smem:[#allocation3_spill]]  ;;  %v2074_v9 = vpack.c.bf16 %v157_v8, %v156_v7  ;;  %v159_v11 = vld [vmem:[%s2985_s3 + $0x18] sm:$0xff]  ;;  %v160_v13 = vld [vmem:[%s2985_s3 + $0x20] sm:$0xff]  ;;  %v161_v14 = vld [vmem:[%s2985_s3 + $0x28] sm:$0xff]  ;;  %vm1559_vm5 = vcmask 7168  }
   0x3   :  { %s3006_s20 = sld [smem:[#allocation4_spill]]  ;;  %v2078_v12 = vpack.c.bf16 %v159_v11, %v158_v10  ;;  %v2082_v16 = vpack.c.bf16 %v161_v14, %v160_v13  ;;  %v162_v17 = vld [vmem:[%s2985_s3 + $0x30] sm:$0xff]  ;;  %v163_v18 = vld [vmem:[%s2985_s3 + $0x38] sm:$0xff]  ;;  %v164_v21 = vld [vmem:[%s2985_s3 + $0x40] sm:$0xff] }
   0x4   :  { %2075 = vmatprep.subr.bf16.mxu1 %v2074_v9  ;;  %v2086_v20 = vpack.c.bf16 %v163_v18, %v162_v17  ;;  %v165_v22 = vld [vmem:[%s2985_s3 + $0x48] sm:$0xff]  ;;  %v166_v24 = vld [vmem:[%s2985_s3 + $0x50] sm:$0xff]  ;;  %v167_v25 = vld [vmem:[%s2985_s3 + $0x58] sm:$0xff] }
   0x5   :  { %2077 = vmatpush3.bf16.msra.mxu1 %v2074_v9  ;;  %v2090_v23 = vpack.c.bf16 %v165_v22, %v164_v21  ;;  %v2094_v26 = vpack.c.bf16 %v167_v25, %v166_v24  ;;  %v257_v27 = vld [vmem:[%s2986_s5] sm:$0xff]  ;;  %v258_v28 = vld [vmem:[%s2986_s5 + $0x8] sm:$0xff]  ;;  %v259_v29 = vld [vmem:[%s2986_s5 + $0x10] sm:$0xff] }
   0x6   :  { %2079 = vmatprep.subr.bf16.mxu1 %v2078_v12  ;;  %v2098_v30 = vpack.c.bf16 %v258_v28, %v257_v27  ;;  %v260_v31 = vld [vmem:[%s2986_s5 + $0x18] sm:$0xff]  ;;  %v261_v33 = vld [vmem:[%s2986_s5 + $0x20] sm:$0xff]  ;;  %v262_v34 = vld [vmem:[%s2986_s5 + $0x28] sm:$0xff] }
   0x7   :  { %v2102_v32 = vpack.c.bf16 %v260_v31, %v259_v29  ;;  %v2106_v35 = vpack.c.bf16 %v262_v34, %v261_v33  ;;  %v1580_v36 = vld [vmem:[%s2987_s2] ss:$0 sm:$0xff]  ;;  %v263_v43 = vld [vmem:[%s2986_s5 + $0x30] sm:$0xff]  ;;  %v264_v44 = vld [vmem:[%s2986_s5 + $0x38] sm:$0xff] }
   0x8   :  { %v60_v0 = vld [vmem:[%s3005_s26] sm:$0xff]  ;;  %v61_v1 = vld [vmem:[%s3005_s26 + $0x8] sm:$0xff]  ;;  %v62_v2 = vld [vmem:[%s3005_s26 + $0x10] sm:$0xff]  ;;  %v2110_v45 = vpack.c.bf16 %v264_v44, %v263_v43 }
   0x9   :  { %v2066_v3 = vpack.c.bf16 %v61_v1, %v60_v0  ;;  %v63_v4 = vld [vmem:[%s3005_s26 + $0x18] sm:$0xff]  ;;  %v58_v5 = vld [vmem:[%s3006_s20] sm:$0xff]  ;;  %v59_v19 = vld [vmem:[%s3006_s20 + $0x8] sm:$0xff]  ;;  %2081 = vmatpush3.bf16.msra.mxu1 %v2078_v12  ;;  %v2256_v0 = vmov 0.0   ;;  %v2257_v1 = vmov 1966171168  }
   0xa   :  { %v2070_v6 = vpack.c.bf16 %v63_v4, %v62_v2  ;;  %1790 = vmatprep.mubr.msk.f32.mxu0 %vm72_vm0, %v58_v5  ;;  %v64_v15 = vld [vmem:[%s3005_s26 + $0x20] sm:$0xff]  ;;  %2083 = vmatprep.subr.bf16.mxu1 %v2082_v16  ;;  %v348_v47 = vld [vmem:[%s2988_s6 + $0x8] sm:$0xff]  ;;  %v349_v51 = vld [vmem:[%s2988_s6 + $0x10] sm:$0xff]  ;;  %v434_v2 = vunpack.c.l.s4 %v2257_v1 }
   0xb   :  { %2067 = vmatprep.subr.bf16.mxu0 %v2066_v3  ;;  %v347_v46 = vld [vmem:[%s2988_s6] sm:$0xff]  ;;  %v350_v52 = vld [vmem:[%s2988_s6 + $0x18] sm:$0xff]  ;;  %v352_v58 = vld [vmem:[%s2988_s6 + $0x28] sm:$0xff] }
   0xc   :  { %2069 = vmatpush3.bf16.msra.mxu0 %v2066_v3  ;;  %v2114_v48 = vpack.c.bf16 %v348_v47, %v347_v46  ;;  %v1583_v49 = vld [vmem:[%s2989_s4] ss:$0 sm:$0xff]  ;;  %v2118_v56 = vpack.c.bf16 %v350_v52, %v349_v51  ;;  %v353_v60 = vld [vmem:[%s2988_s6 + $0x30] sm:$0xff]  ;;  %v354_v61 = vld [vmem:[%s2988_s6 + $0x38] sm:$0xff]  ;;  %v436_v3 = vlaneseq  ;;  %v435_v4 = vunpack.c.0.s8 %v434_v2 }
   0xd   :  { %2071 = vmatprep.subr.bf16.mxu0 %v2070_v6  ;;  %2085 = vmatpush3.bf16.msra.mxu1 %v2082_v16  ;;  %v351_v57 = vld [vmem:[%s2988_s6 + $0x20] sm:$0xff]  ;;  %v2126_v62 = vpack.c.bf16 %v354_v61, %v353_v60 }
   0xe   :  { %2087 = vmatprep.subr.bf16.mxu1 %v2086_v20  ;;  %v2122_v59 = vpack.c.bf16 %v352_v58, %v351_v57  ;;  %v437_v5 = vshrl.u32 %v436_v3, 7 }
  0x10   :  { %2073 = vmatpush3.bf16.msra.mxu0 %v2070_v6  ;;  %v438_v6 = vsub.s32 %v435_v4, %v437_v5  ;;  %v2471_v24 = vsub.s32 0, %v437_v5 }
  0x11   :  { %1788 = vmatprep.subr.mxu0 %v64_v15  ;;  %2089 = vmatpush3.bf16.msra.mxu1 %v2086_v20 }
  0x12   :  { %2091 = vmatprep.subr.bf16.mxu1 %v2090_v23 }
  0x14   :  { %1789 = vmatpush3.msra.mxu0 %v64_v15 }
  0x15   :  { %1791 = vmatmul.mubr.msk.f32.vlgmr.msra.gmra.mrb[0].mxu0 %vm72_vm0, %v59_v19  ;;  %2093 = vmatpush3.bf16.msra.mxu1 %v2090_v23 }
  0x16   :  { %2095 = vmatprep.subr.bf16.mxu1 %v2094_v26  ;;  %2099 = vmatprep.subr.bf16.mxu0 %v2098_v30 }
  0x17   :  { %2101 = vmatpush3.bf16.msra.mxu0 %v2098_v30 }
  0x18   :  { %2103 = vmatprep.subr.bf16.mxu0 %v2102_v32 }
  0x19   :  { %2097 = vmatpush3.bf16.msra.mxu1 %v2094_v26 }
  0x1a   :  { %2154 = vmatprep.subr.bf16.mxu1 %v2254_v63 }
  0x1b   :  { %2105 = vmatpush3.bf16.msra.mxu0 %v2102_v32 }
  0x1c   :  { %2107 = vmatprep.subr.bf16.mxu0 %v2106_v35 }
  0x1f   :  { %2109 = vmatpush3.bf16.msra.mxu0 %v2106_v35 }
  0x20   :  { %2111 = vmatprep.subr.bf16.mxu0 %v2110_v45 }
  0x23   :  { %2113 = vmatpush3.bf16.msra.mxu0 %v2110_v45 }
  0x24   :  { %2115 = vmatprep.subr.bf16.mxu0 %v2114_v48 }
  0xe8   :  { %v1792_v37 = vpop.f32.mrb[0].mxu0 }
  0xe9   :  { %v151_v38 = vadd.f32 %v1792_v37, %v1580_v36  ;;  %v145_v39 = vpop.f32.mrb[1].mxu0 }
  0xea   :  { %v146_v40 = vadd.f32 %v1580_v36, %v145_v39 }
  0xeb   :  { %v155_v42 = vmax.f32 %v151_v38, 0.0 }
  0xec   :  { %v154_v41 = vmax.f32 %v146_v40, 0.0 }
  0xee   :  { %1817 = vmatprep.mubr.msk.f32.mxu1 %vm175_vm1, %v154_v41 }
  0xef   :  { %1818 = vmatmul.mubr.msk.f32.vlgmr.msra.gmra.mrb[0].mxu1 %vm175_vm1, %v155_v42 }
  0xf0   :  { %1925 = vmatprep.mubr.msk.f32.mxu1 %vm2255_vm3, %v2256_v0 }
 0x1c2   :  { %v1819_v50 = vpop.f32.mrb[0].mxu1 }
 0x1c3   :  { %v248_v53 = vpop.f32.mrb[1].mxu1  ;;  %v254_v55 = vadd.f32 %v1819_v50, %v1583_v49 }
 0x1c4   :  { %v249_v54 = vadd.f32 %v1583_v49, %v248_v53 }
 0x1c6   :  { %1836 = vmatprep.mubr.msk.f32.mxu0 %vm265_vm2, %v249_v54 }
 0x1c7   :  { %1837 = vmatmul.mubr.msk.f32.vlgmr.msra.gmra.mrb[2].mxu0 %vm265_vm2, %v254_v55 }
 0x1c8   :  { %2117 = vmatpush3.bf16.msra.mxu0 %v2114_v48  ;;  %1855 = vmatprep.mubr.msk.f32.mxu0 %vm265_vm2, %v249_v54  ;;  %v2488_v48 = vld [vmem:[%s2990_s7] ss:$0 sm:$0xff] }
 0x1c9   :  { %2119 = vmatprep.subr.bf16.mxu0 %v2118_v56 }
 0x1cc   :  { %2121 = vmatpush3.bf16.msra.mxu0 %v2118_v56 }
 0x1cd   :  { %2123 = vmatprep.subr.bf16.mxu0 %v2122_v59 }
 0x1d0   :  { %2125 = vmatpush3.bf16.msra.mxu0 %v2122_v59 }
 0x1d1   :  { %2127 = vmatprep.subr.bf16.mxu0 %v2126_v62 }
 0x1d4   :  { %2129 = vmatpush3.bf16.msra.mxu0 %v2126_v62 }
 0x1d5   :  { %2130 = vmatprep.subr.bf16.mxu0 %v2254_v63 }
 0x1d7   :  { %1856 = vmatmul.mubr.msk.f32.vlgmr.msra.gmra.mrb[4].mxu0 %vm265_vm2, %v254_v55 }
 0x1d8   :  { %1890 = vmatprep.mubr.msk.f32.mxu0 %vm2255_vm3, %v2256_v0 }
 0x29a   :  { %v1838_v7 = vpop.f32.mrb[2].mxu0 }
 0x29b   :  { %v488_v8 = vrot.slane %v1838_v7, %v438_v6  ;;  %v338_v9 = vpop.f32.mrb[3].mxu0  ;;  %v481_v10 = vcombine.high %v1838_v7, %v1838_v7 }
 0x29c   :  { %v432_v11 = vcombine.high %v338_v9, %v338_v9  ;;  %v439_v12 = vrot.slane %v338_v9, %v438_v6 }
 0x29d   :  { %v496_v13 = vcombine.high %v488_v8, %v488_v8  ;;  %v495_v16 = vrot.slane %v481_v10, %v438_v6  ;;  %v504_v17 = vrot.slane %v488_v8, %v438_v6 }
 0x29e   :  { %v446_v14 = vrot.slane %v432_v11, %v438_v6  ;;  %v447_v15 = vcombine.high %v439_v12, %v439_v12  ;;  %v455_v20 = vrot.slane %v439_v12, %v438_v6 }
 0x29f   :  { %v518_v18 = vrot.slane %v496_v13, %v438_v6  ;;  %v497_v25 = vcombine.high %v495_v16, %v495_v16  ;;  %v526_v26 = vcombine.high %v504_v17, %v504_v17  ;;  %v511_v32 = vrot.slane %v495_v16, %v438_v6 }
 0x2a0   :  { %v448_v19 = vcombine.high %v446_v14, %v446_v14  ;;  %v462_v21 = vrot.slane %v446_v14, %v438_v6  ;;  %v469_v22 = vrot.slane %v447_v15, %v438_v6  ;;  %v477_v28 = vcombine.high %v455_v20, %v455_v20 }
 0x2a1   :  { %v528_v27 = vcombine.high %v518_v18, %v518_v18  ;;  %v565_v33 = vrot.slane %v504_v17, %v2471_v24  ;;  %v525_v34 = vrot.slane %v497_v25, %v438_v6  ;;  %v569_v35 = vrot.slane %v518_v18, %v2471_v24 }
 0x2a2   :  { %v476_v23 = vrot.slane %v448_v19, %v438_v6  ;;  %v478_v29 = vcombine.high %v462_v21, %v462_v21  ;;  %v479_v30 = vcombine.high %v469_v22, %v469_v22  ;;  %v573_v36 = vrot.slane %v526_v26, %v2471_v24 }
 0x2a3   :  { %v577_v37 = vrot.slane %v528_v27, %v2471_v24  ;;  %v533_v38 = vrot.slane %v455_v20, %v2471_v24  ;;  %v537_v39 = vrot.slane %v469_v22, %v2471_v24  ;;  %v541_v40 = vrot.slane %v477_v28, %v2471_v24 }
 0x2a4   :  { %v480_v31 = vcombine.high %v476_v23, %v476_v23  ;;  %v549_v41 = vrot.slane %v462_v21, %v2471_v24  ;;  %v545_v42 = vrot.slane %v479_v30, %v2471_v24  ;;  %v553_v43 = vrot.slane %v476_v23, %v2471_v24 }
 0x2a5   :  { %v557_v44 = vrot.slane %v478_v29, %v2471_v24  ;;  %v527_v6 = vcombine.high %v511_v32, %v511_v32  ;;  %v529_v7 = vcombine.high %v525_v34, %v525_v34  ;;  %v581_v8 = vrot.slane %v511_v32, %v2471_v24 }
 0x2a6   :  { %v561_v45 = vrot.slane %v480_v31, %v2471_v24  ;;  %v585_v14 = vrot.slane %v525_v34, %v2471_v24 }
 0x2a7   :  { %v589_v17 = vrot.slane %v527_v6, %v2471_v24  ;;  %v593_v18 = vrot.slane %v529_v7, %v2471_v24  ;;  %v903_v7 = vld [vmem:[%s2992_s10 + $0x20] sm:$0xff] }
 0x2aa   :  { %v1857_v46 = vpop.f32.mrb[4].mxu0 }
 0x2ab   :  { %v421_v47 = vpop.f32.mrb[5].mxu0  ;;  %v618_v49 = vadd.f32 %v1857_v46, %v565_v33  ;;  %v619_v50 = vadd.f32 %v1857_v46, %v569_v35  ;;  %v620_v51 = vadd.f32 %v1857_v46, %v573_v36  ;;  %v621_v52 = vadd.f32 %v1857_v46, %v577_v37 }
 0x2ac   :  { %v610_v53 = vadd.f32 %v533_v38, %v421_v47  ;;  %v611_v54 = vadd.f32 %v537_v39, %v421_v47  ;;  %v612_v55 = vadd.f32 %v541_v40, %v421_v47  ;;  %v613_v56 = vadd.f32 %v545_v42, %v421_v47 }
 0x2ad   :  { %v614_v57 = vadd.f32 %v549_v41, %v421_v47  ;;  %v615_v58 = vadd.f32 %v553_v43, %v421_v47  ;;  %v616_v59 = vadd.f32 %v557_v44, %v421_v47  ;;  %v617_v60 = vadd.f32 %v561_v45, %v421_v47 }
 0x2ae   :  { %v2491_v61 = vadd.f32 %v2488_v48, %v610_v53  ;;  %v2494_v62 = vadd.f32 %v2488_v48, %v611_v54  ;;  %v2497_v1 = vadd.f32 %v2488_v48, %v612_v55  ;;  %v2500_v2 = vadd.f32 %v2488_v48, %v613_v56 }
 0x2af   :  { %v2510_v9 = vadd.f32 %v2488_v48, %v614_v57  ;;  %v2517_v13 = vadd.f32 %v2488_v48, %v615_v58  ;;  %v622_v16 = vadd.f32 %v1857_v46, %v581_v8  ;;  %v2527_v19 = vadd.f32 %v2488_v48, %v616_v59  ;;  %v2607_v58 = vld [vmem:[%s2991_s16] sm:$0x1]  ;;  %v904_v8 = vld [vmem:[%s2992_s10 + $0x28] sm:$0xff] }
 0x2b0   :  { %v2131_v3 = vpack.c.bf16 %v2494_v62, %v2491_v61  ;;  %v721_v4 = vmul.f32 %v2491_v61, %v2491_v61  ;;  %v722_v5 = vmul.f32 %v2494_v62, %v2494_v62  ;;  %v723_v11 = vmul.f32 %v2497_v1, %v2497_v1  ;;  %v899_v59 = vld [vmem:[%s2992_s10] sm:$0xff] }
 0x2b1   :  { %v724_v12 = vmul.f32 %v2500_v2, %v2500_v2  ;;  %v2134_v15 = vpack.c.bf16 %v2500_v2, %v2497_v1  ;;  %v2530_v20 = vadd.f32 %v2488_v48, %v617_v60  ;;  %v725_v22 = vmul.f32 %v2510_v9, %v2510_v9  ;;  %v900_v60 = vld [vmem:[%s2992_s10 + $0x8] sm:$0xff] }
 0x2b2   :  { %2132 = vmatpush3.bf16.msra.mxu0 %v2131_v3  ;;  %v2155_v10 = vpack.c.bf16 %v722_v5, %v721_v4  ;;  %v726_v23 = vmul.f32 %v2517_v13, %v2517_v13  ;;  %v623_v25 = vadd.f32 %v1857_v46, %v585_v14  ;;  %v624_v26 = vadd.f32 %v1857_v46, %v589_v17  ;;  %v901_v3 = vld [vmem:[%s2992_s10 + $0x10] sm:$0xff]  ;;  %v902_v5 = vld [vmem:[%s2992_s10 + $0x18] sm:$0xff] }
 0x2b3   :  { %2133 = vmatprep.subr.bf16.mxu0 %v2254_v63  ;;  %v2158_v21 = vpack.c.bf16 %v724_v12, %v723_v11  ;;  %v625_v27 = vadd.f32 %v1857_v46, %v593_v18  ;;  %v2137_v28 = vpack.c.bf16 %v2517_v13, %v2510_v9  ;;  %v727_v29 = vmul.f32 %v2527_v19, %v2527_v19  ;;  %v905_v11 = vld [vmem:[%s2992_s10 + $0x30] sm:$0xff]  ;;  %v906_v12 = vld [vmem:[%s2992_s10 + $0x38] sm:$0xff] }
 0x2b4   :  { %2156 = vmatpush3.bf16.msra.mxu1 %v2155_v10  ;;  %v2161_v30 = vpack.c.bf16 %v726_v23, %v725_v22  ;;  %v728_v31 = vmul.f32 %v2530_v20, %v2530_v20  ;;  %v2545_v32 = vadd.f32 %v2488_v48, %v618_v49  ;;  %v2548_v33 = vadd.f32 %v2488_v48, %v619_v50 }
 0x2b5   :  { %2157 = vmatprep.subr.bf16.mxu1 %v2254_v63  ;;  %v2140_v34 = vpack.c.bf16 %v2530_v20, %v2527_v19  ;;  %v2555_v35 = vadd.f32 %v2488_v48, %v620_v51  ;;  %v2558_v36 = vadd.f32 %v2488_v48, %v621_v52  ;;  %v2573_v44 = vadd.f32 %v2488_v48, %v622_v16 }
 0x2b6   :  { %2135 = vmatpush3.bf16.msra.mxu0 %v2134_v15  ;;  %v2164_v37 = vpack.c.bf16 %v728_v31, %v727_v29  ;;  %v729_v38 = vmul.f32 %v2545_v32, %v2545_v32  ;;  %v730_v39 = vmul.f32 %v2548_v33, %v2548_v33  ;;  %v2143_v40 = vpack.c.bf16 %v2548_v33, %v2545_v32 }
 0x2b7   :  { %2136 = vmatprep.subr.bf16.mxu0 %v2254_v63  ;;  %v731_v41 = vmul.f32 %v2555_v35, %v2555_v35  ;;  %v732_v42 = vmul.f32 %v2558_v36, %v2558_v36  ;;  %v2576_v45 = vadd.f32 %v2488_v48, %v623_v25  ;;  %v2146_v46 = vpack.c.bf16 %v2558_v36, %v2555_v35 }
 0x2b8   :  { %2159 = vmatpush3.bf16.msra.mxu1 %v2158_v21  ;;  %v2167_v43 = vpack.c.bf16 %v730_v39, %v729_v38  ;;  %v733_v49 = vmul.f32 %v2573_v44, %v2573_v44  ;;  %v2587_v51 = vadd.f32 %v2488_v48, %v624_v26  ;;  %v2590_v52 = vadd.f32 %v2488_v48, %v625_v27  ;;  %v2648_v39 = vld [vmem:[%s2993_s8] ss:$0 sm:$0xff] }
 0x2b9   :  { %2160 = vmatprep.subr.bf16.mxu1 %v2254_v63  ;;  %v2170_v47 = vpack.c.bf16 %v732_v42, %v731_v41  ;;  %v734_v50 = vmul.f32 %v2576_v45, %v2576_v45  ;;  %v2149_v53 = vpack.c.bf16 %v2576_v45, %v2573_v44  ;;  %v2178_v4 = vpack.c.bf16 %v900_v60, %v899_v59 }
 0x2ba   :  { %2138 = vmatpush3.bf16.msra.mxu0 %v2137_v28  ;;  %v735_v55 = vmul.f32 %v2587_v51, %v2587_v51  ;;  %v736_v56 = vmul.f32 %v2590_v52, %v2590_v52  ;;  %v2152_v48 = vpack.c.bf16 %v2590_v52, %v2587_v51  ;;  %v2182_v6 = vpack.c.bf16 %v902_v5, %v901_v3 }
 0x2bb   :  { %2139 = vmatprep.subr.bf16.mxu0 %v2254_v63  ;;  %v2173_v54 = vpack.c.bf16 %v734_v50, %v733_v49  ;;  %v2186_v10 = vpack.c.bf16 %v904_v8, %v903_v7  ;;  %v2190_v14 = vpack.c.bf16 %v906_v12, %v905_v11 }
 0x2bc   :  { %2162 = vmatpush3.bf16.msra.mxu1 %v2161_v30  ;;  %v2176_v57 = vpack.c.bf16 %v736_v56, %v735_v55 }
 0x2bd   :  { %2163 = vmatprep.subr.bf16.mxu1 %v2254_v63 }
 0x2be   :  { %2141 = vmatpush3.bf16.msra.mxu0 %v2140_v34 }
 0x2bf   :  { %2142 = vmatprep.subr.bf16.mxu0 %v2254_v63 }
 0x2c0   :  { %2165 = vmatpush3.bf16.msra.mxu1 %v2164_v37 }
 0x2c1   :  { %2166 = vmatprep.subr.bf16.mxu1 %v2254_v63 }
 0x2c2   :  { %2144 = vmatpush3.bf16.msra.mxu0 %v2143_v40 }
 0x2c3   :  { %2145 = vmatprep.subr.bf16.mxu0 %v2254_v63 }
 0x2c4   :  { %2168 = vmatpush3.bf16.msra.mxu1 %v2167_v43 }
 0x2c5   :  { %2169 = vmatprep.subr.bf16.mxu1 %v2254_v63 }
 0x2c6   :  { %2147 = vmatpush3.bf16.msra.mxu0 %v2146_v46 }
 0x2c7   :  { %2148 = vmatprep.subr.bf16.mxu0 %v2254_v63 }
 0x2c8   :  { %2171 = vmatpush3.bf16.msra.mxu1 %v2170_v47 }
 0x2c9   :  { %2172 = vmatprep.subr.bf16.mxu1 %v2254_v63 }
 0x2ca   :  { %2150 = vmatpush3.bf16.msra.mxu0 %v2149_v53 }
 0x2cb   :  { %2151 = vmatprep.subr.bf16.mxu0 %v2254_v63 }
 0x2cc   :  { %2174 = vmatpush3.bf16.msra.mxu1 %v2173_v54 }
 0x2cd   :  { %2175 = vmatprep.subr.bf16.mxu1 %v2254_v63 }
 0x2ce   :  { %2153 = vmatpush3.bf16.msra.mxu0 %v2152_v48 }
 0x2cf   :  { %2179 = vmatprep.subr.bf16.mxu0 %v2178_v4 }
 0x2d0   :  { %2177 = vmatpush3.bf16.msra.mxu1 %v2176_v57 }
 0x2d1   :  { %1891 = vmatmul.mubr.f32.vlgmr.msra.gmra.mrb[6].mxu0 %v2607_v58  ;;  %2194 = vmatprep.subr.bf16.mxu1 %v2254_v63 }
 0x2d2   :  { %2181 = vmatpush3.bf16.msra.mxu0 %v2178_v4 }
 0x2d3   :  { %1926 = vmatmul.mubr.f32.vlgmr.msra.gmra.mrb[2].mxu1 %v2607_v58  ;;  %2183 = vmatprep.subr.bf16.mxu0 %v2182_v6 }
 0x2d4   :  { %2000 = vmatprep.mubr.msk.f32.mxu1 %vm2255_vm3, %v2256_v0 }
 0x2d6   :  { %2185 = vmatpush3.bf16.msra.mxu0 %v2182_v6 }
 0x2d7   :  { %2187 = vmatprep.subr.bf16.mxu0 %v2186_v10 }
 0x2da   :  { %2189 = vmatpush3.bf16.msra.mxu0 %v2186_v10 }
 0x2db   :  { %2191 = vmatprep.subr.bf16.mxu0 %v2190_v14 }
 0x2de   :  { %2193 = vmatpush3.bf16.msra.mxu0 %v2190_v14 }
 0x2df   :  { %2218 = vmatprep.subr.bf16.mxu0 %v2254_v63 }
 0x3a4   :  { %v716_v15 = vpop.f32.mrb[6].mxu0 }
 0x3a5   :  { %v720_v16 = vmul.f32 0.008928572, %v716_v15  ;;  %v1892_v17 = vpop.f32.mrb[7].mxu0 }
 0x3a6   :  { %v803_v18 = vpop.f32.mrb[2].mxu1 }
 0x3a7   :  { %v808_v21 = vmul.f32 %v720_v16, %v720_v16  ;;  %v807_v22 = vmul.f32 0.008928572, %v803_v18  ;;  %v1927_v23 = vpop.f32.mrb[3].mxu1  ;;  %v814_v28 = vrot.slane %v720_v16, %v2471_v24 }
 0x3a9   :  { %v809_v25 = vsub.f32 %v807_v22, %v808_v21  ;;  %v815_v30 = vsub.f32 %v2491_v61, %v814_v28  ;;  %v816_v34 = vsub.f32 %v2494_v62, %v814_v28  ;;  %v817_v37 = vsub.f32 %v2497_v1, %v814_v28  ;;  %v2657_v1 = vld [vmem:[%s2994_s9] ss:$0 sm:$0xff] }
 0x3aa   :  { %v818_v38 = vsub.f32 %v2500_v2, %v814_v28  ;;  %v819_v40 = vsub.f32 %v2510_v9, %v814_v28  ;;  %v820_v41 = vsub.f32 %v2517_v13, %v814_v28  ;;  %v821_v42 = vsub.f32 %v2527_v19, %v814_v28 }
 0x3ab   :  { %v810_v26 = vmax.f32 %v809_v25, 0.0  ;;  %v822_v61 = vsub.f32 %v2530_v20, %v814_v28  ;;  %v823_v20 = vsub.f32 %v2545_v32, %v814_v28  ;;  %v824_v54 = vsub.f32 %v2548_v33, %v814_v28 }
 0x3ac   :  { %v825_v55 = vsub.f32 %v2555_v35, %v814_v28  ;;  %v826_v56 = vsub.f32 %v2558_v36, %v814_v28  ;;  %v827_v48 = vsub.f32 %v2573_v44, %v814_v28  ;;  %v828_v60 = vsub.f32 %v2576_v45, %v814_v28 }
 0x3ad   :  { %v831_v27 = vadd.f32 1e-05, %v810_v26  ;;  %v829_v3 = vsub.f32 %v2587_v51, %v814_v28  ;;  %v830_v35 = vsub.f32 %v2590_v52, %v814_v28 }
 0x3af   :  { %2250 = vrsqrt.f32 %v831_v27 }
 0x3b9   :  { %v2251_v29 = vpop.eup %2250 }
 0x3ba   :  { %v836_v31 = vrot.slane %v2251_v29, %v2471_v24 }
 0x3bc   :  { %v837_v43 = vmul.f32 %v836_v31, %v815_v30  ;;  %v838_v46 = vmul.f32 %v836_v31, %v816_v34  ;;  %v839_v62 = vmul.f32 %v836_v31, %v817_v37  ;;  %v840_v47 = vmul.f32 %v836_v31, %v818_v38 }
 0x3bd   :  { %v841_v2 = vmul.f32 %v836_v31, %v819_v40  ;;  %v842_v49 = vmul.f32 %v836_v31, %v820_v41  ;;  %v843_v50 = vmul.f32 %v836_v31, %v821_v42  ;;  %v844_v53 = vmul.f32 %v836_v31, %v822_v61  ;;  %v2720_v42 = vld [vmem:[%s2995_s11] ss:$0 sm:$0xff] }
 0x3be   :  { %v860_v9 = vmul.f32 %v2648_v39, %v837_v43  ;;  %v861_v13 = vmul.f32 %v2648_v39, %v838_v46  ;;  %v862_v19 = vmul.f32 %v2648_v39, %v839_v62  ;;  %v863_v32 = vmul.f32 %v2648_v39, %v840_v47 }
 0x3bf   :  { %v864_v33 = vmul.f32 %v2648_v39, %v841_v2  ;;  %v845_v36 = vmul.f32 %v836_v31, %v823_v20  ;;  %v846_v44 = vmul.f32 %v836_v31, %v824_v54  ;;  %v847_v5 = vmul.f32 %v836_v31, %v825_v55 }
 0x3c0   :  { %v883_v57 = vadd.f32 %v2657_v1, %v860_v9  ;;  %v884_v59 = vadd.f32 %v2657_v1, %v861_v13  ;;  %v885_v4 = vadd.f32 %v2657_v1, %v862_v19  ;;  %v848_v6 = vmul.f32 %v836_v31, %v826_v56 }
 0x3c1   :  { %v849_v7 = vmul.f32 %v836_v31, %v827_v48  ;;  %v850_v45 = vmul.f32 %v836_v31, %v828_v60  ;;  %v851_v8 = vmul.f32 %v836_v31, %v829_v3  ;;  %v852_v51 = vmul.f32 %v836_v31, %v830_v35 }
 0x3c2   :  { %1944 = vmatprep.mubr.msk.f32.mxu0 %vm265_vm2, %v883_v57  ;;  %v886_v10 = vadd.f32 %v2657_v1, %v863_v32  ;;  %v865_v11 = vmul.f32 %v2648_v39, %v842_v49  ;;  %v887_v52 = vadd.f32 %v2657_v1, %v864_v33  ;;  %v866_v12 = vmul.f32 %v2648_v39, %v843_v50 }
 0x3c3   :  { %1945 = vmatmul.mubr.msk.f32.vlgmr.msra.gmra.mrb[8].mxu0 %vm265_vm2, %v884_v59  ;;  %v867_v15 = vmul.f32 %v2648_v39, %v844_v53  ;;  %v868_v17 = vmul.f32 %v2648_v39, %v845_v36  ;;  %v869_v21 = vmul.f32 %v2648_v39, %v846_v44  ;;  %v870_v23 = vmul.f32 %v2648_v39, %v847_v5 }
 0x3c4   :  { %1947 = vmatprep.mubr.msk.f32.mxu0 %vm265_vm2, %v885_v4  ;;  %v888_v14 = vadd.f32 %v2657_v1, %v865_v11  ;;  %v889_v16 = vadd.f32 %v2657_v1, %v866_v12  ;;  %v871_v26 = vmul.f32 %v2648_v39, %v848_v6  ;;  %v872_v28 = vmul.f32 %v2648_v39, %v849_v7 }
 0x3c5   :  { %v890_v18 = vadd.f32 %v2657_v1, %v867_v15  ;;  %v891_v22 = vadd.f32 %v2657_v1, %v868_v17  ;;  %v892_v25 = vadd.f32 %v2657_v1, %v869_v21  ;;  %v893_v27 = vadd.f32 %v2657_v1, %v870_v23 }
 0x3c6   :  { %v894_v29 = vadd.f32 %v2657_v1, %v871_v26  ;;  %v873_v30 = vmul.f32 %v2648_v39, %v850_v45  ;;  %v895_v31 = vadd.f32 %v2657_v1, %v872_v28  ;;  %v874_v34 = vmul.f32 %v2648_v39, %v851_v8 }
 0x3c7   :  { %1948 = vmatmul.mubr.msk.f32.gmra.mrb[10].mxu0 %vm265_vm2, %v886_v10  ;;  %v875_v38 = vmul.f32 %v2648_v39, %v852_v51 }
 0x3c8   :  { %1950 = vmatprep.mubr.msk.f32.mxu0 %vm265_vm2, %v887_v52  ;;  %v896_v37 = vadd.f32 %v2657_v1, %v873_v30  ;;  %v897_v40 = vadd.f32 %v2657_v1, %v874_v34 }
 0x3c9   :  { %v898_v41 = vadd.f32 %v2657_v1, %v875_v38 }
 0x3cb   :  { %1951 = vmatmul.mubr.msk.f32.gmra.mrb[12].mxu0 %vm265_vm2, %v888_v14 }
 0x3cc   :  { %1953 = vmatprep.mubr.msk.f32.mxu0 %vm265_vm2, %v889_v16 }
 0x3cf   :  { %1954 = vmatmul.mubr.msk.f32.gmra.mrb[14].mxu0 %vm265_vm2, %v890_v18 }
 0x3d0   :  { %1956 = vmatprep.mubr.msk.f32.mxu0 %vm265_vm2, %v891_v22 }
 0x3d3   :  { %1957 = vmatmul.mubr.msk.f32.gmra.mrb[16].mxu0 %vm265_vm2, %v892_v25 }
 0x3d4   :  { %1959 = vmatprep.mubr.msk.f32.mxu0 %vm265_vm2, %v893_v27 }
 0x3d7   :  { %1960 = vmatmul.mubr.msk.f32.gmra.mrb[18].mxu0 %vm265_vm2, %v894_v29 }
 0x3d8   :  { %1962 = vmatprep.mubr.msk.f32.mxu0 %vm265_vm2, %v895_v31 }
 0x3db   :  { %1963 = vmatmul.mubr.msk.f32.gmra.mrb[20].mxu0 %vm265_vm2, %v896_v37 }
 0x3dc   :  { %1965 = vmatprep.mubr.msk.f32.mxu0 %vm265_vm2, %v897_v40 }
 0x3df   :  { %1966 = vmatmul.mubr.msk.f32.gmra.mrb[22].mxu0 %vm265_vm2, %v898_v41 }
 0x3e0   :  { %2035 = vmatprep.mubr.msk.f32.mxu0 %vm2255_vm3, %v2256_v0 }
 0x496   :  { %v1946_v61 = vpop.f32.mrb[8].mxu0 }
 0x497   :  { %v2723_v39 = vadd.f32 %v1946_v61, %v2720_v42  ;;  %v1028_v43 = vpop.f32.mrb[9].mxu0 }
 0x498   :  { %v2726_v46 = vadd.f32 %v2720_v42, %v1028_v43 }
 0x499   :  { %v1179_v62 = vmul.f32 %v2723_v39, %v2723_v39 }
 0x49a   :  { %v2195_v47 = vpack.c.bf16 %v2723_v39, %v2726_v46  ;;  %v1178_v0 = vmul.f32 %v2726_v46, %v2726_v46  ;;  %v1949_v1 = vpop.f32.mrb[10].mxu0 }
 0x49b   :  { %v2735_v2 = vadd.f32 %v1949_v1, %v2720_v42  ;;  %v1038_v49 = vpop.f32.mrb[11].mxu0 }
 0x49c   :  { %v2219_v50 = vpack.c.bf16 %v1179_v62, %v1178_v0  ;;  %v2738_v53 = vadd.f32 %v2720_v42, %v1038_v49  ;;  %2196 = vmatpush3.bf16.msra.mxu1 %v2195_v47  ;;  %v1357_v0 = vld [vmem:[%s2996_s14 + $0x8] sm:$0xff] }
 0x49d   :  { %v1181_v9 = vmul.f32 %v2735_v2, %v2735_v2  ;;  %2197 = vmatprep.subr.bf16.mxu1 %v2254_v63 }
 0x49e   :  { %v2198_v13 = vpack.c.bf16 %v2735_v2, %v2738_v53  ;;  %v1180_v19 = vmul.f32 %v2738_v53, %v2738_v53  ;;  %v1952_v20 = vpop.f32.mrb[12].mxu0  ;;  %2220 = vmatpush3.bf16.msra.mxu0 %v2219_v50 }
 0x49f   :  { %v2748_v54 = vadd.f32 %v1952_v20, %v2720_v42  ;;  %v1048_v55 = vpop.f32.mrb[13].mxu0  ;;  %2221 = vmatprep.subr.bf16.mxu0 %v2254_v63 }
 0x4a0   :  { %v2222_v56 = vpack.c.bf16 %v1181_v9, %v1180_v19  ;;  %v2752_v48 = vadd.f32 %v2720_v42, %v1048_v55  ;;  %2199 = vmatpush3.bf16.msra.mxu1 %v2198_v13 }
 0x4a1   :  { %v1183_v57 = vmul.f32 %v2748_v54, %v2748_v54  ;;  %2200 = vmatprep.subr.bf16.mxu1 %v2254_v63 }
 0x4a2   :  { %v2201_v59 = vpack.c.bf16 %v2748_v54, %v2752_v48  ;;  %v1182_v60 = vmul.f32 %v2752_v48, %v2752_v48  ;;  %v1955_v3 = vpop.f32.mrb[14].mxu0  ;;  %2223 = vmatpush3.bf16.msra.mxu0 %v2222_v56 }
 0x4a3   :  { %v2762_v4 = vadd.f32 %v1955_v3, %v2720_v42  ;;  %v1058_v32 = vpop.f32.mrb[15].mxu0  ;;  %2224 = vmatprep.subr.bf16.mxu0 %v2254_v63 }
 0x4a4   :  { %v2225_v33 = vpack.c.bf16 %v1183_v57, %v1182_v60  ;;  %v2766_v35 = vadd.f32 %v2720_v42, %v1058_v32  ;;  %2202 = vmatpush3.bf16.msra.mxu1 %v2201_v59 }
 0x4a5   :  { %v1185_v36 = vmul.f32 %v2762_v4, %v2762_v4  ;;  %2203 = vmatprep.subr.bf16.mxu1 %v2254_v63 }
 0x4a6   :  { %v2204_v44 = vpack.c.bf16 %v2762_v4, %v2766_v35  ;;  %v1184_v5 = vmul.f32 %v2766_v35, %v2766_v35  ;;  %v1958_v6 = vpop.f32.mrb[16].mxu0  ;;  %2226 = vmatpush3.bf16.msra.mxu0 %v2225_v33 }
 0x4a7   :  { %v2776_v7 = vadd.f32 %v1958_v6, %v2720_v42  ;;  %v1068_v45 = vpop.f32.mrb[17].mxu0  ;;  %2227 = vmatprep.subr.bf16.mxu0 %v2254_v63 }
 0x4a8   :  { %v2228_v8 = vpack.c.bf16 %v1185_v36, %v1184_v5  ;;  %v2780_v51 = vadd.f32 %v2720_v42, %v1068_v45  ;;  %2205 = vmatpush3.bf16.msra.mxu1 %v2204_v44  ;;  %v2852_v5 = vld [vmem:[%s2998_s12] ss:$0 sm:$0xff] }
 0x4a9   :  { %v1187_v10 = vmul.f32 %v2776_v7, %v2776_v7  ;;  %2206 = vmatprep.subr.bf16.mxu1 %v2254_v63 }
 0x4aa   :  { %v2207_v11 = vpack.c.bf16 %v2776_v7, %v2780_v51  ;;  %v1186_v52 = vmul.f32 %v2780_v51, %v2780_v51  ;;  %v1961_v12 = vpop.f32.mrb[18].mxu0  ;;  %2229 = vmatpush3.bf16.msra.mxu0 %v2228_v8 }
 0x4ab   :  { %v2790_v14 = vadd.f32 %v1961_v12, %v2720_v42  ;;  %v1078_v15 = vpop.f32.mrb[19].mxu0  ;;  %2230 = vmatprep.subr.bf16.mxu0 %v2254_v63 }
 0x4ac   :  { %v2231_v16 = vpack.c.bf16 %v1187_v10, %v1186_v52  ;;  %v2794_v17 = vadd.f32 %v2720_v42, %v1078_v15  ;;  %2208 = vmatpush3.bf16.msra.mxu1 %v2207_v11 }
 0x4ad   :  { %v1189_v18 = vmul.f32 %v2790_v14, %v2790_v14  ;;  %2209 = vmatprep.subr.bf16.mxu1 %v2254_v63 }
 0x4ae   :  { %v2210_v21 = vpack.c.bf16 %v2790_v14, %v2794_v17  ;;  %v1188_v22 = vmul.f32 %v2794_v17, %v2794_v17  ;;  %v1964_v23 = vpop.f32.mrb[20].mxu0  ;;  %2232 = vmatpush3.bf16.msra.mxu0 %v2231_v16 }
 0x4af   :  { %v2804_v25 = vadd.f32 %v1964_v23, %v2720_v42  ;;  %v1088_v26 = vpop.f32.mrb[21].mxu0  ;;  %2233 = vmatprep.subr.bf16.mxu0 %v2254_v63 }
 0x4b0   :  { %v2234_v27 = vpack.c.bf16 %v1189_v18, %v1188_v22  ;;  %v2808_v28 = vadd.f32 %v2720_v42, %v1088_v26  ;;  %2211 = vmatpush3.bf16.msra.mxu1 %v2210_v21 }
 0x4b1   :  { %v1191_v29 = vmul.f32 %v2804_v25, %v2804_v25  ;;  %2212 = vmatprep.subr.bf16.mxu1 %v2254_v63 }
 0x4b2   :  { %v2213_v30 = vpack.c.bf16 %v2804_v25, %v2808_v28  ;;  %v1190_v31 = vmul.f32 %v2808_v28, %v2808_v28  ;;  %v1967_v34 = vpop.f32.mrb[22].mxu0  ;;  %2235 = vmatpush3.bf16.msra.mxu0 %v2234_v27 }
 0x4b3   :  { %v2818_v37 = vadd.f32 %v1967_v34, %v2720_v42  ;;  %v1098_v38 = vpop.f32.mrb[23].mxu0  ;;  %2236 = vmatprep.subr.bf16.mxu0 %v2254_v63 }
 0x4b4   :  { %v2237_v40 = vpack.c.bf16 %v1191_v29, %v1190_v31  ;;  %v2822_v41 = vadd.f32 %v2720_v42, %v1098_v38  ;;  %2214 = vmatpush3.bf16.msra.mxu1 %v2213_v30  ;;  %v1356_v42 = vld [vmem:[%s2996_s14] sm:$0xff] }
 0x4b5   :  { %v1193_v61 = vmul.f32 %v2818_v37, %v2818_v37  ;;  %2215 = vmatprep.subr.bf16.mxu1 %v2254_v63  ;;  %v2242_v1 = vpack.c.bf16 %v1357_v0, %v1356_v42 }
 0x4b6   :  { %v2216_v43 = vpack.c.bf16 %v2818_v37, %v2822_v41  ;;  %v1192_v62 = vmul.f32 %v2822_v41, %v2822_v41  ;;  %2238 = vmatpush3.bf16.msra.mxu0 %v2237_v40 }
 0x4b7   :  { %2239 = vmatprep.subr.bf16.mxu0 %v2254_v63  ;;  %v22_v63 = vstv %s2997_s15 }
 0x4b8   :  { %v2240_v47 = vpack.c.bf16 %v1193_v61, %v1192_v62  ;;  %2217 = vmatpush3.bf16.msra.mxu1 %v2216_v43  ;;  %23 = vst [vmem:[#allocation2] sm:$0x1] %v22_v63 }
 0x4b9   :  { %2243 = vmatprep.subr.bf16.mxu1 %v2242_v1 }
 0x4ba   :  { %2241 = vmatpush3.bf16.msra.mxu0 %v2240_v47 }
 0x4bb   :  { %2001 = vmatmul.mubr.f32.vlgmr.msra.gmra.mrb[4].mxu1 %v2607_v58 }
 0x4bc   :  { %2245 = vmatpush3.bf16.msra.mxu1 %v2242_v1 }
 0x4bd   :  { %2036 = vmatmul.mubr.f32.vlgmr.msra.gmra.mrb[24].mxu0 %v2607_v58 }
 0x58e   :  { %v1173_v49 = vpop.f32.mrb[4].mxu1 }
 0x58f   :  { %v1177_v50 = vmul.f32 0.008928572, %v1173_v49  ;;  %v2002_v9 = vpop.f32.mrb[5].mxu1 }
 0x590   :  { %v1260_v58 = vpop.f32.mrb[24].mxu0 }
 0x591   :  { %v1265_v13 = vmul.f32 %v1177_v50, %v1177_v50  ;;  %v1264_v19 = vmul.f32 0.008928572, %v1260_v58  ;;  %v2037_v20 = vpop.f32.mrb[25].mxu0  ;;  %v1271_v59 = vrot.slane %v1177_v50, %v2471_v24 }
 0x593   :  { %v1266_v55 = vsub.f32 %v1264_v19, %v1265_v13  ;;  %v1272_v3 = vsub.f32 %v2726_v46, %v1271_v59  ;;  %v1273_v33 = vsub.f32 %v2723_v39, %v1271_v59  ;;  %v1274_v36 = vsub.f32 %v2738_v53, %v1271_v59 }
 0x594   :  { %v1275_v44 = vsub.f32 %v2735_v2, %v1271_v59  ;;  %v1276_v6 = vsub.f32 %v2752_v48, %v1271_v59  ;;  %v1277_v45 = vsub.f32 %v2748_v54, %v1271_v59  ;;  %v1278_v46 = vsub.f32 %v2766_v35, %v1271_v59  ;;  %v2861_v2 = vld [vmem:[%s2999_s13] ss:$0 sm:$0xff] }
 0x595   :  { %v1267_v56 = vmax.f32 %v1266_v55, 0.0  ;;  %v1279_v8 = vsub.f32 %v2762_v4, %v1271_v59  ;;  %v1280_v4 = vsub.f32 %v2780_v51, %v1271_v59  ;;  %v1281_v16 = vsub.f32 %v2776_v7, %v1271_v59 }
 0x596   :  { %v1282_v18 = vsub.f32 %v2794_v17, %v1271_v59  ;;  %v1283_v21 = vsub.f32 %v2790_v14, %v1271_v59  ;;  %v1284_v22 = vsub.f32 %v2808_v28, %v1271_v59  ;;  %v1285_v27 = vsub.f32 %v2804_v25, %v1271_v59 }
 0x597   :  { %v1288_v57 = vadd.f32 1e-05, %v1267_v56  ;;  %v1286_v29 = vsub.f32 %v2822_v41, %v1271_v59  ;;  %v1287_v17 = vsub.f32 %v2818_v37, %v1271_v59 }
 0x599   :  { %2252 = vrsqrt.f32 %v1288_v57 }
 0x5a3   :  { %v2253_v60 = vpop.eup %2252 }
 0x5a4   :  { %v1293_v32 = vrot.slane %v2253_v60, %v2471_v24 }
 0x5a6   :  { %v1294_v24 = vmul.f32 %v1293_v32, %v1272_v3  ;;  %v1295_v10 = vmul.f32 %v1293_v32, %v1273_v33  ;;  %v1296_v39 = vmul.f32 %v1293_v32, %v1274_v36  ;;  %v1297_v11 = vmul.f32 %v1293_v32, %v1275_v44  ;;  %v1612_v36 = vld [vmem:[#allocation2] ss:$0 sm:$0xff] }
 0x5a7   :  { %v1298_v53 = vmul.f32 %v1293_v32, %v1276_v6  ;;  %v1299_v52 = vmul.f32 %v1293_v32, %v1277_v45  ;;  %v1300_v12 = vmul.f32 %v1293_v32, %v1278_v46  ;;  %v1301_v15 = vmul.f32 %v1293_v32, %v1279_v8 }
 0x5a8   :  { %v1317_v48 = vmul.f32 %v2852_v5, %v1294_v24  ;;  %v1318_v54 = vmul.f32 %v2852_v5, %v1295_v10  ;;  %v1319_v35 = vmul.f32 %v2852_v5, %v1296_v39  ;;  %v1320_v51 = vmul.f32 %v2852_v5, %v1297_v11 }
 0x5a9   :  { %v1321_v7 = vmul.f32 %v2852_v5, %v1298_v53  ;;  %v1302_v14 = vmul.f32 %v1293_v32, %v1280_v4  ;;  %v1303_v28 = vmul.f32 %v1293_v32, %v1281_v16  ;;  %v1304_v31 = vmul.f32 %v1293_v32, %v1282_v18 }
 0x5aa   :  { %v1340_v23 = vadd.f32 %v2861_v2, %v1317_v48  ;;  %v1341_v26 = vadd.f32 %v2861_v2, %v1318_v54  ;;  %v1342_v30 = vadd.f32 %v2861_v2, %v1319_v35  ;;  %v1305_v34 = vmul.f32 %v1293_v32, %v1283_v21 }
 0x5ab   :  { %v1306_v38 = vmul.f32 %v1293_v32, %v1284_v22  ;;  %v1307_v25 = vmul.f32 %v1293_v32, %v1285_v27  ;;  %v1308_v40 = vmul.f32 %v1293_v32, %v1286_v29  ;;  %v1309_v41 = vmul.f32 %v1293_v32, %v1287_v17 }
 0x5ac   :  { %2042 = vmatprep.mubr.msk.f32.mxu1 %vm1365_vm4, %v1340_v23  ;;  %v1343_v61 = vadd.f32 %v2861_v2, %v1320_v51  ;;  %v1322_v43 = vmul.f32 %v2852_v5, %v1299_v52  ;;  %v1344_v37 = vadd.f32 %v2861_v2, %v1321_v7  ;;  %v1323_v62 = vmul.f32 %v2852_v5, %v1300_v12 }
 0x5ad   :  { %2043 = vmatmul.mubr.msk.f32.vlgmr.msra.gmra.mrb[6].mxu1 %vm1365_vm4, %v1341_v26  ;;  %v1324_v42 = vmul.f32 %v2852_v5, %v1301_v15  ;;  %v1325_v1 = vmul.f32 %v2852_v5, %v1302_v14  ;;  %v1326_v49 = vmul.f32 %v2852_v5, %v1303_v28  ;;  %v1327_v9 = vmul.f32 %v2852_v5, %v1304_v31 }
 0x5ae   :  { %2045 = vmatprep.mubr.msk.f32.mxu1 %vm1365_vm4, %v1342_v30  ;;  %v1345_v47 = vadd.f32 %v2861_v2, %v1322_v43  ;;  %v1346_v0 = vadd.f32 %v2861_v2, %v1323_v62  ;;  %v1328_v13 = vmul.f32 %v2852_v5, %v1305_v34  ;;  %v1329_v20 = vmul.f32 %v2852_v5, %v1306_v38 }
 0x5af   :  { %v1347_v63 = vadd.f32 %v2861_v2, %v1324_v42  ;;  %v1348_v50 = vadd.f32 %v2861_v2, %v1325_v1  ;;  %v1349_v58 = vadd.f32 %v2861_v2, %v1326_v49  ;;  %v1350_v19 = vadd.f32 %v2861_v2, %v1327_v9 }
 0x5b0   :  { %v1351_v55 = vadd.f32 %v2861_v2, %v1328_v13  ;;  %v1330_v56 = vmul.f32 %v2852_v5, %v1307_v25  ;;  %v1352_v57 = vadd.f32 %v2861_v2, %v1329_v20  ;;  %v1331_v59 = vmul.f32 %v2852_v5, %v1308_v40 }
 0x5b1   :  { %2046 = vmatmul.mubr.msk.f32.gmra.mrb[8].mxu1 %vm1365_vm4, %v1343_v61  ;;  %v1332_v3 = vmul.f32 %v2852_v5, %v1309_v41 }
 0x5b2   :  { %2048 = vmatprep.mubr.msk.f32.mxu1 %vm1365_vm4, %v1344_v37  ;;  %v1353_v60 = vadd.f32 %v2861_v2, %v1330_v56  ;;  %v1354_v32 = vadd.f32 %v2861_v2, %v1331_v59 }
 0x5b3   :  { %v1355_v33 = vadd.f32 %v2861_v2, %v1332_v3 }
 0x5b5   :  { %2049 = vmatmul.mubr.msk.f32.gmra.mrb[10].mxu1 %vm1365_vm4, %v1345_v47 }
 0x5b6   :  { %2051 = vmatprep.mubr.msk.f32.mxu1 %vm1365_vm4, %v1346_v0 }
 0x5b9   :  { %2052 = vmatmul.mubr.msk.f32.gmra.mrb[12].mxu1 %vm1365_vm4, %v1347_v63 }
 0x5ba   :  { %2054 = vmatprep.mubr.msk.f32.mxu1 %vm1365_vm4, %v1348_v50 }
 0x5bd   :  { %2055 = vmatmul.mubr.msk.f32.gmra.mrb[14].mxu1 %vm1365_vm4, %v1349_v58 }
 0x5be   :  { %2057 = vmatprep.mubr.msk.f32.mxu1 %vm1365_vm4, %v1350_v19 }
 0x5c1   :  { %2058 = vmatmul.mubr.msk.f32.gmra.mrb[16].mxu1 %vm1365_vm4, %v1351_v55 }
 0x5c2   :  { %2060 = vmatprep.mubr.msk.f32.mxu1 %vm1365_vm4, %v1352_v57 }
 0x5c5   :  { %2061 = vmatmul.mubr.msk.f32.gmra.mrb[18].mxu1 %vm1365_vm4, %v1353_v60 }
 0x5c6   :  { %2063 = vmatprep.mubr.msk.f32.mxu1 %vm1365_vm4, %v1354_v32 }
 0x5c9   :  { %2064 = vmatmul.mubr.msk.f32.gmra.mrb[20].mxu1 %vm1365_vm4, %v1355_v33 }
 0x680   :  { %v2044_v44 = vpop.f32.mrb[6].mxu1 }
 0x681   :  { %v1486_v6 = vadd.f32 %v2044_v44, %v1612_v36  ;;  %v1480_v45 = vpop.f32.mrb[7].mxu1 }
 0x682   :  { %v1481_v46 = vadd.f32 %v1612_v36, %v1480_v45 }
 0x683   :  { %1561 = vst.msk [vmem:[%s3000_s17 + $0x8] sm:$0xff] %vm1559_vm5, %v1486_v6 }
 0x684   :  { %1560 = vst.msk [vmem:[%s3000_s17] sm:$0xff] %vm1559_vm5, %v1481_v46  ;;  %v2047_v5 = vpop.f32.mrb[8].mxu1 }
 0x685   :  { %v1496_v8 = vadd.f32 %v2047_v5, %v1612_v36  ;;  %v1490_v24 = vpop.f32.mrb[9].mxu1 }
 0x686   :  { %v1491_v10 = vadd.f32 %v1612_v36, %v1490_v24 }
 0x687   :  { %1563 = vst.msk [vmem:[%s3000_s17 + $0x18] sm:$0xff] %vm1559_vm5, %v1496_v8 }
 0x688   :  { %1562 = vst.msk [vmem:[%s3000_s17 + $0x10] sm:$0xff] %vm1559_vm5, %v1491_v10  ;;  %v2050_v39 = vpop.f32.mrb[10].mxu1 }
 0x689   :  { %v1506_v11 = vadd.f32 %v2050_v39, %v1612_v36  ;;  %v1500_v2 = vpop.f32.mrb[11].mxu1 }
 0x68a   :  { %v1501_v53 = vadd.f32 %v1612_v36, %v1500_v2 }
 0x68b   :  { %1565 = vst.msk [vmem:[%s3000_s17 + $0x28] sm:$0xff] %vm1559_vm5, %v1506_v11 }
 0x68c   :  { %1564 = vst.msk [vmem:[%s3000_s17 + $0x20] sm:$0xff] %vm1559_vm5, %v1501_v53  ;;  %v2053_v52 = vpop.f32.mrb[12].mxu1 }
 0x68d   :  { %v1516_v12 = vadd.f32 %v2053_v52, %v1612_v36  ;;  %v1510_v15 = vpop.f32.mrb[13].mxu1 }
 0x68e   :  { %v1511_v48 = vadd.f32 %v1612_v36, %v1510_v15 }
 0x68f   :  { %1567 = vst.msk [vmem:[%s3000_s17 + $0x38] sm:$0xff] %vm1559_vm5, %v1516_v12 }
 0x690   :  { %1566 = vst.msk [vmem:[%s3000_s17 + $0x30] sm:$0xff] %vm1559_vm5, %v1511_v48  ;;  %v2056_v54 = vpop.f32.mrb[14].mxu1 }
 0x691   :  { %v1526_v35 = vadd.f32 %v2056_v54, %v1612_v36  ;;  %v1520_v4 = vpop.f32.mrb[15].mxu1 }
 0x692   :  { %v1521_v16 = vadd.f32 %v1612_v36, %v1520_v4 }
 0x693   :  { %1569 = vst.msk [vmem:[%s3000_s17 + $0x48] sm:$0xff] %vm1559_vm5, %v1526_v35 }
 0x694   :  { %1568 = vst.msk [vmem:[%s3000_s17 + $0x40] sm:$0xff] %vm1559_vm5, %v1521_v16  ;;  %v2059_v18 = vpop.f32.mrb[16].mxu1 }
 0x695   :  { %v1536_v21 = vadd.f32 %v2059_v18, %v1612_v36  ;;  %v1530_v22 = vpop.f32.mrb[17].mxu1 }
 0x696   :  { %v1531_v23 = vadd.f32 %v1612_v36, %v1530_v22 }
 0x697   :  { %1571 = vst.msk [vmem:[%s3000_s17 + $0x58] sm:$0xff] %vm1559_vm5, %v1536_v21 }
 0x698   :  { %1570 = vst.msk [vmem:[%s3000_s17 + $0x50] sm:$0xff] %vm1559_vm5, %v1531_v23  ;;  %v2062_v26 = vpop.f32.mrb[18].mxu1 }
 0x699   :  { %v1546_v27 = vadd.f32 %v2062_v26, %v1612_v36  ;;  %v1540_v29 = vpop.f32.mrb[19].mxu1 }
 0x69a   :  { %v1541_v30 = vadd.f32 %v1612_v36, %v1540_v29 }
 0x69b   :  { %1573 = vst.msk [vmem:[%s3000_s17 + $0x68] sm:$0xff] %vm1559_vm5, %v1546_v27 }
 0x69c   :  { %1572 = vst.msk [vmem:[%s3000_s17 + $0x60] sm:$0xff] %vm1559_vm5, %v1541_v30  ;;  %v2065_v51 = vpop.f32.mrb[20].mxu1 }
 0x69d   :  { %v1556_v7 = vadd.f32 %v2065_v51, %v1612_v36  ;;  %v1550_v17 = vpop.f32.mrb[21].mxu1 }
 0x69e   :  { %v1551_v14 = vadd.f32 %v1612_v36, %v1550_v17 }
 0x69f   :  { %1575 = vst.msk [vmem:[%s3000_s17 + $0x78] sm:$0xff] %vm1559_vm5, %v1556_v7 }
 0x6a0   :  { %1574 = vst.msk [vmem:[%s3000_s17 + $0x70] sm:$0xff] %vm1559_vm5, %v1551_v14 }

</bundles_post_ra>
